<compile_context>
chip_gen: v5e
topology: v5e:2x2
jax: 0.10.0
libtpu: 0.0.40
codegen_flags: <defaults>
</compile_context>

<pallas_src>
import numpy as np
import jax
import jax.numpy as jnp
from jax.experimental import pallas as pl
from jax.experimental.pallas import tpu as pltpu


LANE = 128      # lane width: output padded to this for dense stores
SUBLANE = 8
MAX_TILE_M = 256   # fills the 2x256^2 MXU on v6e/v7x; harmless on v5e


def _round_up(x, m):
    return ((x + m - 1) // m) * m


# ---------------------------------------------------------------------------
# Kernel: one-hot MXU gather + Linear -> ReLU -> Linear (fully fused)
# ---------------------------------------------------------------------------
def move_embedding_net_kernel(idx_ref, emb_ref, w1_ref, b1_ref, w2_ref, b2_ref,
                              out_ref):
    idx = idx_ref[...]                                   # (tile_m, 1) int32
    tile_m = idx.shape[0]
    num_moves_pad = emb_ref.shape[0]

    # ---- Gather: one-hot @ table, one MXU pass (table is VMEM-resident) ----
    iota = jax.lax.broadcasted_iota(jnp.int32, (tile_m, num_moves_pad), 1)
    one_hot = (idx == iota).astype(jnp.bfloat16)         # exact 0/1 in bf16
    x = jnp.dot(one_hot, emb_ref[...],
                preferred_element_type=jnp.float32)      # (tile_m, D) f32

    # ---- hidden = ReLU(x @ W1 + b1): bf16 MXU inputs, f32 accumulate -------
    h = jnp.dot(x.astype(jnp.bfloat16), w1_ref[...],
                preferred_element_type=jnp.float32) + b1_ref[...]
    h = jnp.maximum(h, 0.0)

    # TODO(synk): Dropout(p=0.1) is eval-mode identity here; training-mode
    # dropout (pltpu.prng_random_bits mask) is not implemented.

    # ---- out = h @ W2_pad + b2_pad: lane-dense (tile_m, 128) store ----------
    out = jnp.dot(h.astype(jnp.bfloat16), w2_ref[...],
                  preferred_element_type=jnp.float32) + b2_ref[...]
    out_ref[...] = out.astype(out_ref.dtype)


# ---------------------------------------------------------------------------
# One-time parameter prep (transpose / pad / cast) — not per forward call
# ---------------------------------------------------------------------------
def prepare_params(full_embeddings, w_hidden, b_hidden, w_out, b_out):
    num_moves, embed_dim = full_embeddings.shape
    hidden_dim = w_hidden.shape[0]
    output_dim = w_out.shape[0]
    out_pad = _round_up(output_dim, LANE)
    # bf16 sublane packing is 16-deep: pad the table's row count accordingly.
    num_moves_pad = _round_up(num_moves, 16)

    # Embedding table: bf16, VMEM-resident inside the kernel.
    emb = jnp.zeros((num_moves_pad, embed_dim), jnp.bfloat16)
    emb = emb.at[:num_moves, :].set(full_embeddings.astype(jnp.bfloat16))

    w1 = w_hidden.T.astype(jnp.bfloat16)                       # (D, H) bf16
    b1 = b_hidden.reshape(1, hidden_dim).astype(jnp.float32)   # (1, H) f32

    w2 = jnp.zeros((hidden_dim, out_pad), jnp.float32)
    w2 = w2.at[:, :output_dim].set(w_out.T).astype(jnp.bfloat16)   # (H, 128)
    b2 = jnp.zeros((1, out_pad), jnp.float32).at[0, :output_dim].set(b_out)

    return dict(emb=emb, w1=w1, b1=b1, w2=w2, b2=b2,
                num_moves=num_moves, output_dim=output_dim)


# ---------------------------------------------------------------------------
# Forward wrapper
# ---------------------------------------------------------------------------
def move_embedding_network_forward(move_indices, params):
    """move_indices: (batch, 4) int32.  Returns (batch, 4, output_dim) f32."""
    emb, w1, b1, w2, b2 = (params["emb"], params["w1"], params["b1"],
                           params["w2"], params["b2"])
    num_moves = params["num_moves"]
    output_dim = params["output_dim"]
    num_moves_pad, embed_dim = emb.shape
    hidden_dim = w1.shape[1]
    out_pad = w2.shape[1]

    batch, moves_per_batch = move_indices.shape
    n = batch * moves_per_batch

    # Clamp untrusted indices (torch index_select raises on OOB; clamping
    # keeps the one-hot gather within the real table rows).
    flat_idx = jnp.clip(move_indices.reshape(-1).astype(jnp.int32),
                        0, num_moves - 1)

    # Row-tiling: small inputs -> one sublane-aligned tile; large inputs ->
    # 256-row tiles (fills the v6e/v7x MXU; also fine on v5e).  The grid axis
    # is "parallel" so v7x's two TensorCores split the tiles when there are
    # >= 2 of them.
    tile_m = min(MAX_TILE_M, _round_up(n, SUBLANE))
    n_pad = _round_up(n, tile_m)
    idx_pad = jnp.zeros((n_pad, 1), jnp.int32).at[:n, 0].set(flat_idx)

    out_padded = pl.pallas_call(
        move_embedding_net_kernel,
        out_shape=jax.ShapeDtypeStruct((n_pad, out_pad), jnp.float32),
        grid_spec=pltpu.PrefetchScalarGridSpec(
            num_scalar_prefetch=0,
            grid=(n_pad // tile_m,),
            in_specs=[
                # Per-tile move indices.
                pl.BlockSpec((tile_m, 1), lambda i: (i, 0)),
                # Embedding table + weights/biases: constant block index ->
                # fetched once, VMEM-resident across grid steps.
                pl.BlockSpec((num_moves_pad, embed_dim), lambda i: (0, 0)),
                pl.BlockSpec((embed_dim, hidden_dim), lambda i: (0, 0)),
                pl.BlockSpec((1, hidden_dim), lambda i: (0, 0)),
                pl.BlockSpec((hidden_dim, out_pad), lambda i: (0, 0)),
                pl.BlockSpec((1, out_pad), lambda i: (0, 0)),
            ],
            out_specs=pl.BlockSpec((tile_m, out_pad), lambda i: (i, 0)),
        ),
        compiler_params=pltpu.CompilerParams(
            dimension_semantics=("parallel",)),
    )(idx_pad, emb, w1, b1, w2, b2)

    out = out_padded[:n, :output_dim].reshape(batch, moves_per_batch, output_dim)
    # torch code squeezes only if output_dim == 1; here output_dim=4.
    if output_dim == 1:
        out = out[..., 0]
    return out


# ---------------------------------------------------------------------------
# Deterministic "synthetic checkpoint" construction (mirrors __init__ shapes)
# ---------------------------------------------------------------------------
def build_params(key, num_moves, embed_dim, hidden_dim, output_dim,
                 num_non_learnable=41):
    keys = jax.random.split(key, 6)

    # Split of the 256-d embedding: 41 non-learnable + 215 learnable features.
    non_learnable_indices = jnp.arange(num_non_learnable)
    learnable_indices = jnp.arange(num_non_learnable, embed_dim)

    learnable_embeddings = jax.random.normal(
        keys[0], (num_moves, embed_dim - num_non_learnable), dtype=jnp.float32)
    non_learnable_embeddings = jax.random.normal(
        keys[1], (num_moves, num_non_learnable), dtype=jnp.float32)

    # Reassemble the full (num_moves, embed_dim) table exactly as the torch
    # forward scatters learnable/non-learnable columns back together.
    full = jnp.zeros((num_moves, embed_dim), dtype=jnp.float32)
    full = full.at[:, learnable_indices].set(learnable_embeddings)
    full = full.at[:, non_learnable_indices].set(non_learnable_embeddings)

    # nn.Linear weights (torch layout: [out_features, in_features]).
    w_hidden = jax.random.normal(keys[2], (hidden_dim, embed_dim),
                                 dtype=jnp.float32) * 0.05
    b_hidden = jax.random.normal(keys[3], (hidden_dim,), dtype=jnp.float32) * 0.05
    w_out = jax.random.normal(keys[4], (output_dim, hidden_dim),
                              dtype=jnp.float32) * 0.05
    b_out = jax.random.normal(keys[5], (output_dim,), dtype=jnp.float32) * 0.05

    return full, w_hidden, b_hidden, w_out, b_out


def reference_forward(move_indices, full_embeddings, w_hidden, b_hidden,
                      w_out, b_out):
    """Pure-JAX f32 reference matching the torch forward (eval-mode dropout)."""
    batch, moves_per_batch = move_indices.shape
    embeds = full_embeddings[move_indices.reshape(-1)]          # (N, D)
    h = jnp.maximum(embeds @ w_hidden.T + b_hidden, 0.0)        # (N, H)
    out = h @ w_out.T + b_out                                   # (N, O)
    return out.reshape(batch, moves_per_batch, -1)


if __name__ == "__main__":
    # Small, module-consistent shapes:
    #   batch=2, 4 moves per battler, 16 moves in the table,
    #   embed_dim=256 (41 non-learnable + 215 learnable), hidden=256, output=4
    batch = 2
    moves_per_batch = 4
    num_moves = 16
    embed_dim = 256
    hidden_dim = 256
    output_dim = 4

    key = jax.random.PRNGKey(0)
    pkey, ikey = jax.random.split(key)

    full_emb, w_h, b_h, w_o, b_o = build_params(
        pkey, num_moves, embed_dim, hidden_dim, output_dim)

    move_indices = jax.random.randint(
        ikey, (batch, moves_per_batch), 0, num_moves, dtype=jnp.int32)

    params = prepare_params(full_emb, w_h, b_h, w_o, b_o)

    out = move_embedding_network_forward(move_indices, params)
    out = jax.block_until_ready(out)

    ref = reference_forward(move_indices, full_emb, w_h, b_h, w_o, b_o)

    assert out.shape == (batch, moves_per_batch, output_dim), out.shape
    # Kernel uses a bf16 table + bf16 MXU inputs with f32 accumulation ->
    # compare against the pure-f32 reference with bf16-appropriate tolerances.
    np.testing.assert_allclose(np.asarray(out), np.asarray(ref),
                               rtol=2e-2, atol=2e-2)
    print("KERNEL_OK")
</pallas_src>

<mosaic_0001>
module attributes {stable_mosaic.version = 11 : i64} {
  func.func @move_embedding_net_kernel(%arg0: i32, %arg1: memref<8x1xi32, #tpu.memory_space<vmem>>, %arg2: memref<16x256xbf16, #tpu.memory_space<vmem>>, %arg3: memref<256x256xbf16, #tpu.memory_space<vmem>>, %arg4: memref<1x256xf32, #tpu.memory_space<vmem>>, %arg5: memref<256x128xbf16, #tpu.memory_space<vmem>>, %arg6: memref<1x128xf32, #tpu.memory_space<vmem>>, %arg7: memref<8x128xf32, #tpu.memory_space<vmem>>) attributes {dimension_semantics = [#tpu.dimension_semantics<parallel>], iteration_bounds = array<i64: 1>, scalar_prefetch = 0 : i64, scratch_operands = 0 : i64, tpu.core_type = #tpu.core_type<tc>, window_params = [{transform_indices = @transform_0, window_bounds = array<i64: 8, 1>}, {pipeline_mode = #tpu.pipeline_mode<synchronous>, transform_indices = @transform_1, window_bounds = array<i64: 16, 256>}, {pipeline_mode = #tpu.pipeline_mode<synchronous>, transform_indices = @transform_2, window_bounds = array<i64: 256, 256>}, {pipeline_mode = #tpu.pipeline_mode<synchronous>, transform_indices = @transform_3, window_bounds = array<i64: 1, 256>}, {pipeline_mode = #tpu.pipeline_mode<synchronous>, transform_indices = @transform_4, window_bounds = array<i64: 256, 128>}, {pipeline_mode = #tpu.pipeline_mode<synchronous>, transform_indices = @transform_5, window_bounds = array<i64: 1, 128>}, {transform_indices = @transform_6, window_bounds = array<i64: 8, 128>}]} {
    %c0 = arith.constant 0 : index
    %c0_0 = arith.constant 0 : index
    %0 = vector.load %arg1[%c0, %c0_0] : memref<8x1xi32, #tpu.memory_space<vmem>>, vector<8x1xi32>
    %1 = tpu.iota {dimensions = array<i32: 1>} : vector<8x16xi32>
    %2 = vector.broadcast %0 : vector<8x1xi32> to vector<8x16xi32>
    %3 = arith.cmpi eq, %2, %1 : vector<8x16xi32>
    %4 = arith.extui %3 : vector<8x16xi1> to vector<8x16xi32>
    %5 = arith.sitofp %4 : vector<8x16xi32> to vector<8x16xf32>
    %6 = arith.truncf %5 : vector<8x16xf32> to vector<8x16xbf16>
    %c0_1 = arith.constant 0 : index
    %c0_2 = arith.constant 0 : index
    %7 = vector.load %arg2[%c0_1, %c0_2] : memref<16x256xbf16, #tpu.memory_space<vmem>>, vector<16x256xbf16>
    %cst = arith.constant dense<0.000000e+00> : vector<8x256xf32>
    %8 = tpu.matmul %6, %7, %cst {dimension_numbers = #tpu.dot_dimension_numbers<[1], [0], [0], [1], [0, 0, 1, 1], [], []>} : vector<8x16xbf16>, vector<16x256xbf16>, vector<8x256xf32> -> vector<8x256xf32>
    %9 = arith.truncf %8 : vector<8x256xf32> to vector<8x256xbf16>
    %c0_3 = arith.constant 0 : index
    %c0_4 = arith.constant 0 : index
    %10 = vector.load %arg3[%c0_3, %c0_4] : memref<256x256xbf16, #tpu.memory_space<vmem>>, vector<256x256xbf16>
    %cst_5 = arith.constant dense<0.000000e+00> : vector<8x256xf32>
    %11 = tpu.matmul %9, %10, %cst_5 {dimension_numbers = #tpu.dot_dimension_numbers<[1], [0], [0], [1], [0, 0, 1, 1], [], []>} : vector<8x256xbf16>, vector<256x256xbf16>, vector<8x256xf32> -> vector<8x256xf32>
    %c0_6 = arith.constant 0 : index
    %c0_7 = arith.constant 0 : index
    %12 = vector.load %arg4[%c0_6, %c0_7] : memref<1x256xf32, #tpu.memory_space<vmem>>, vector<1x256xf32>
    %13 = vector.broadcast %12 : vector<1x256xf32> to vector<8x256xf32>
    %14 = arith.addf %11, %13 : vector<8x256xf32>
    %cst_8 = arith.constant 0.000000e+00 : f32
    %15 = vector.broadcast %cst_8 : f32 to vector<8x256xf32>
    %16 = arith.maximumf %14, %15 : vector<8x256xf32>
    %17 = arith.truncf %16 : vector<8x256xf32> to vector<8x256xbf16>
    %c0_9 = arith.constant 0 : index
    %c0_10 = arith.constant 0 : index
    %18 = vector.load %arg5[%c0_9, %c0_10] : memref<256x128xbf16, #tpu.memory_space<vmem>>, vector<256x128xbf16>
    %cst_11 = arith.constant dense<0.000000e+00> : vector<8x128xf32>
    %19 = tpu.matmul %17, %18, %cst_11 {dimension_numbers = #tpu.dot_dimension_numbers<[1], [0], [0], [1], [0, 0, 1, 1], [], []>} : vector<8x256xbf16>, vector<256x128xbf16>, vector<8x128xf32> -> vector<8x128xf32>
    %c0_12 = arith.constant 0 : index
    %c0_13 = arith.constant 0 : index
    %20 = vector.load %arg6[%c0_12, %c0_13] : memref<1x128xf32, #tpu.memory_space<vmem>>, vector<1x128xf32>
    %21 = vector.broadcast %20 : vector<1x128xf32> to vector<8x128xf32>
    %22 = arith.addf %19, %21 : vector<8x128xf32>
    %c0_14 = arith.constant 0 : index
    %c0_15 = arith.constant 0 : index
    %23 = vector.load %arg7[%c0_14, %c0_15] : memref<8x128xf32, #tpu.memory_space<vmem>>, vector<8x128xf32>
    tpu.vector_store %arg7[%c0_14, %c0_15], %22 {strides = array<i32>} : memref<8x128xf32, #tpu.memory_space<vmem>>, vector<8x128xf32>,
    return
  }
  func.func @transform_0(%arg0: i32) -> (i32, i32) {
    %c0_i32 = arith.constant 0 : i32
    %c0_i32_0 = arith.constant 0 : i32
    return %arg0, %c0_i32 : i32, i32
  }
  func.func @transform_1(%arg0: i32) -> (i32, i32) {
    %c0_i32 = arith.constant 0 : i32
    %c0_i32_0 = arith.constant 0 : i32
    %c0_i32_1 = arith.constant 0 : i32
    return %c0_i32, %c0_i32_0 : i32, i32
  }
  func.func @transform_2(%arg0: i32) -> (i32, i32) {
    %c0_i32 = arith.constant 0 : i32
    %c0_i32_0 = arith.constant 0 : i32
    %c0_i32_1 = arith.constant 0 : i32
    return %c0_i32, %c0_i32_0 : i32, i32
  }
  func.func @transform_3(%arg0: i32) -> (i32, i32) {
    %c0_i32 = arith.constant 0 : i32
    %c0_i32_0 = arith.constant 0 : i32
    %c0_i32_1 = arith.constant 0 : i32
    return %c0_i32, %c0_i32_0 : i32, i32
  }
  func.func @transform_4(%arg0: i32) -> (i32, i32) {
    %c0_i32 = arith.constant 0 : i32
    %c0_i32_0 = arith.constant 0 : i32
    %c0_i32_1 = arith.constant 0 : i32
    return %c0_i32, %c0_i32_0 : i32, i32
  }
  func.func @transform_5(%arg0: i32) -> (i32, i32) {
    %c0_i32 = arith.constant 0 : i32
    %c0_i32_0 = arith.constant 0 : i32
    %c0_i32_1 = arith.constant 0 : i32
    return %c0_i32, %c0_i32_0 : i32, i32
  }
  func.func @transform_6(%arg0: i32) -> (i32, i32) {
    %c0_i32 = arith.constant 0 : i32
    %c0_i32_0 = arith.constant 0 : i32
    return %arg0, %c0_i32 : i32, i32
  }
}

</mosaic_0001>

<bundles_post_ra>
// kernel: tpu_custom_call.1
= control target key start
LH: loop header
LB: loop body
LE: loop exit
PB: predicated region body
PF: predicated region fallthrough
CT: control target
= control target key end

     0   :  { %11 = vsyncpa [#allocation3], 0  ;;  %s990_s0 = inlined_call_operand.vmem [shape: s32[8,1], index: 0, kind: input, shape index: {}]   ;;  %s991_s1 = inlined_call_operand.hbm [shape: bf16[16,256], index: 1, kind: input, shape index: {}]   ;;  %s992_s2 = inlined_call_operand.hbm [shape: bf16[256,256], index: 2, kind: input, shape index: {}]   ;;  %s993_s3 = inlined_call_operand.vmem [shape: f32[1,256], index: 3, kind: input, shape index: {}]   ;;  %s994_s4 = inlined_call_operand.hbm [shape: bf16[256,128], index: 4, kind: input, shape index: {}]   ;;  %s995_s5 = inlined_call_operand.vmem [shape: f32[1,128], index: 5, kind: input, shape index: {}]   ;;  %s996_s6 = inlined_call_operand.hbm [shape: f32[8,128], index: 6, kind: output, shape index: {}]  }
   0x1   :  { %12 = vsyncpa [#allocation6], 0 }
   0x2   :  { %13 = vsyncpa [#allocation4], 0  ;;  %s33_s23 = sshll.u32 %s992_s2, 4  ;;  %s924_s24 = smov [#allocation5]   ;;  %s34_s23 = int_to_ptr.hbm [resolvable:$true] %s33_s23 }
   0x3   :  { %s35_s25 = sshll.u32 %s924_s24, 4  ;;  %s20_s28 = sshll.u32 %s991_s1, 4  ;;  %s36_s25 = int_to_ptr.vmem [resolvable:$true] %s35_s25  ;;  %s21_s28 = int_to_ptr.hbm [resolvable:$true] %s20_s28 }
   0x4   :  { %s925_s29 = smov 128   ;;  %s926_s30 = smov 8  }
   0x5   :  { %41 = dma.hbm_to_vmem [thread:$0]  %s34_s23, 4096, %s36_s25, [#allocation6], %s925_s29, %s925_s29, %s926_s30  }
   0x6   :  { %s927_s7 = smov [#allocation2]   ;;  %s48_s11 = sshll.u32 %s994_s4, 4  ;;  %s49_s11 = int_to_ptr.hbm [resolvable:$true] %s48_s11 }
   0x7   :  { %s22_s8 = sshll.u32 %s927_s7, 4  ;;  %s928_s2 = smov [#allocation7]   ;;  %s23_s8 = int_to_ptr.vmem [resolvable:$true] %s22_s8 }
   0x8   :  { %28 = dma.hbm_to_vmem [thread:$0]  %s21_s28, 256, %s23_s8, [#allocation3], %s925_s29, %s925_s29, %s926_s30  }
   0x9   :  { %s50_s12 = sshll.u32 %s928_s2, 4  ;;  %s929_s13 = smov 64   ;;  %s51_s12 = int_to_ptr.vmem [resolvable:$true] %s50_s12 }
   0xa   :  { %s930_s14 = smov 4  }
   0xb   :  { %56 = dma.hbm_to_vmem [thread:$0]  %s49_s11, 2048, %s51_s12, [#allocation6], %s929_s13, %s929_s13, %s930_s14  }
   0xc   :  { %918 = dma.done.wait [#allocation3], 256  }
   0xd   :  { %919 = vsyncadd [#allocation3], 4294967040 }
   0xe   :  { %920 = dma.done.wait [#allocation6], 6144  }
   0xf   :  { %921 = vsyncadd [#allocation6], 4294961152  ;;  %v931_v0 = vmov 0   ;;  %v72_v1 = vld [vmem:[%s990_s0] sm:$0xff]  ;;  %v761_v3 = vld [vmem:[#allocation2 + $0x4] sm:$0xf0] }
  0x10   :  { %820 = vset.pattern.permute.xlu0 %v931_v0  ;;  %v560_v2 = vld [vmem:[#allocation2] sm:$0xf]  ;;  %v760_v4 = vld [vmem:[#allocation2 + $0x4] sm:$0xf]  ;;  %v562_v6 = vld [vmem:[#allocation2 + $0x8] sm:$0xf0] }
  0x11   :  { %76 = vperm.xlu0 %820, %v72_v1   ;;  %v561_v5 = vor.u32 %v761_v3, %v560_v2  ;;  %v565_v7 = vor.u32 %v760_v4, %v562_v6  ;;  %v626_v8 = vld [vmem:[#allocation5 + $0x70] sm:$0xf]  ;;  %v777_v9 = vld [vmem:[#allocation5 + $0x74] sm:$0xf0]  ;;  %v776_v13 = vld [vmem:[#allocation5 + $0x74] sm:$0xf] }
  0x12   :  { %v690_v10 = vld [vmem:[#allocation5 + $0xf0] sm:$0xf]  ;;  %v627_v11 = vor.u32 %v777_v9, %v626_v8  ;;  %v793_v12 = vld [vmem:[#allocation5 + $0xf4] sm:$0xf0]  ;;  %v628_v14 = vld [vmem:[#allocation5 + $0x78] sm:$0xf0] }
  0x13   :  { %105 = vmatpush.bf16.msra.mxu0 %v561_v5  ;;  %118 = vmatpush.bf16.msra.mxu1 %v565_v7  ;;  %v691_v15 = vor.u32 %v793_v12, %v690_v10  ;;  %v631_v16 = vor.u32 %v776_v13, %v628_v14  ;;  %v792_v17 = vld [vmem:[#allocation5 + $0xf4] sm:$0xf]  ;;  %v692_v18 = vld [vmem:[#allocation5 + $0xf8] sm:$0xf0]  ;;  %v618_v19 = vld [vmem:[#allocation5 + $0x60] sm:$0xf]  ;;  %v73_v13 = vlaneseq }
  0x14   :  { %324 = vmatpush.bf16.msra.mxu2 %v627_v11  ;;  %v695_v20 = vor.u32 %v792_v17, %v692_v18  ;;  %v775_v21 = vld [vmem:[#allocation5 + $0x64] sm:$0xf0]  ;;  %v682_v22 = vld [vmem:[#allocation5 + $0xe0] sm:$0xf]  ;;  %v774_v26 = vld [vmem:[#allocation5 + $0x64] sm:$0xf] }
  0x15   :  { %v791_v23 = vld [vmem:[#allocation5 + $0xe4] sm:$0xf0]  ;;  %337 = vmatpush.bf16.msra.mxu3 %v691_v15  ;;  %v619_v24 = vor.u32 %v775_v21, %v618_v19  ;;  %v620_v27 = vld [vmem:[#allocation5 + $0x68] sm:$0xf0]  ;;  %v790_v28 = vld [vmem:[#allocation5 + $0xe4] sm:$0xf] }
  0x16   :  { %v683_v25 = vor.u32 %v791_v23, %v682_v22  ;;  %v623_v29 = vor.u32 %v774_v26, %v620_v27  ;;  %v684_v30 = vld [vmem:[#allocation5 + $0xe8] sm:$0xf0]  ;;  %v610_v31 = vld [vmem:[#allocation5 + $0x50] sm:$0xf]  ;;  %v773_v32 = vld [vmem:[#allocation5 + $0x54] sm:$0xf0] }
  0x17   :  { %350 = vmatpush.bf16.msrb.mxu0 %v631_v16  ;;  %363 = vmatpush.bf16.msrb.mxu1 %v695_v20  ;;  %v687_v33 = vor.u32 %v790_v28, %v684_v30  ;;  %v674_v34 = vld [vmem:[#allocation5 + $0xd0] sm:$0xf]  ;;  %v789_v35 = vld [vmem:[#allocation5 + $0xd4] sm:$0xf0]  ;;  %v772_v36 = vld [vmem:[#allocation5 + $0x54] sm:$0xf]  ;;  %v611_v37 = vor.u32 %v773_v32, %v610_v31 }
  0x18   :  { %325 = vmatpush.bf16.msra.mxu2 %v619_v24  ;;  %v612_v38 = vld [vmem:[#allocation5 + $0x58] sm:$0xf0]  ;;  %v788_v39 = vld [vmem:[#allocation5 + $0xd4] sm:$0xf]  ;;  %v675_v41 = vor.u32 %v789_v35, %v674_v34  ;;  %v602_v43 = vld [vmem:[#allocation5 + $0x40] sm:$0xf] }
  0x19   :  { %v676_v40 = vld [vmem:[#allocation5 + $0xd8] sm:$0xf0]  ;;  %338 = vmatpush.bf16.msra.mxu3 %v683_v25  ;;  %v615_v42 = vor.u32 %v772_v36, %v612_v38  ;;  %v771_v44 = vld [vmem:[#allocation5 + $0x44] sm:$0xf0]  ;;  %v666_v45 = vld [vmem:[#allocation5 + $0xc0] sm:$0xf] }
  0x1a   :  { %v679_v46 = vor.u32 %v788_v39, %v676_v40  ;;  %v787_v47 = vld [vmem:[#allocation5 + $0xc4] sm:$0xf0]  ;;  %v770_v48 = vld [vmem:[#allocation5 + $0x44] sm:$0xf]  ;;  %v604_v49 = vld [vmem:[#allocation5 + $0x48] sm:$0xf0]  ;;  %v603_v52 = vor.u32 %v771_v44, %v602_v43 }
  0x1b   :  { %351 = vmatpush.bf16.msrb.mxu0 %v623_v29  ;;  %364 = vmatpush.bf16.msrb.mxu1 %v687_v33  ;;  %v786_v50 = vld [vmem:[#allocation5 + $0xc4] sm:$0xf]  ;;  %v668_v51 = vld [vmem:[#allocation5 + $0xc8] sm:$0xf0]  ;;  %v667_v53 = vor.u32 %v787_v47, %v666_v45  ;;  %v607_v54 = vor.u32 %v770_v48, %v604_v49  ;;  %v594_v55 = vld [vmem:[#allocation5 + $0x30] sm:$0xf] }
  0x1c   :  { %326 = vmatpush.bf16.msra.mxu2 %v611_v37  ;;  %v769_v56 = vld [vmem:[#allocation5 + $0x34] sm:$0xf0]  ;;  %v658_v57 = vld [vmem:[#allocation5 + $0xb0] sm:$0xf]  ;;  %v671_v58 = vor.u32 %v786_v50, %v668_v51  ;;  %v768_v60 = vld [vmem:[#allocation5 + $0x34] sm:$0xf] }
  0x1d   :  { %339 = vmatpush.bf16.msra.mxu3 %v675_v41  ;;  %v785_v59 = vld [vmem:[#allocation5 + $0xb4] sm:$0xf0]  ;;  %v596_v61 = vld [vmem:[#allocation5 + $0x38] sm:$0xf0]  ;;  %v784_v62 = vld [vmem:[#allocation5 + $0xb4] sm:$0xf]  ;;  %v595_v0 = vor.u32 %v769_v56, %v594_v55 }
  0x1e   :  { %v660_v63 = vld [vmem:[#allocation5 + $0xb8] sm:$0xf0]  ;;  %v659_v1 = vor.u32 %v785_v59, %v658_v57  ;;  %v599_v2 = vor.u32 %v768_v60, %v596_v61  ;;  %v586_v3 = vld [vmem:[#allocation5 + $0x20] sm:$0xf]  ;;  %v767_v4 = vld [vmem:[#allocation5 + $0x24] sm:$0xf0] }
  0x1f   :  { %352 = vmatpush.bf16.msrb.mxu0 %v615_v42  ;;  %365 = vmatpush.bf16.msrb.mxu1 %v679_v46  ;;  %v650_v5 = vld [vmem:[#allocation5 + $0xa0] sm:$0xf]  ;;  %v663_v6 = vor.u32 %v784_v62, %v660_v63  ;;  %v783_v7 = vld [vmem:[#allocation5 + $0xa4] sm:$0xf0]  ;;  %v766_v8 = vld [vmem:[#allocation5 + $0x24] sm:$0xf]  ;;  %v587_v12 = vor.u32 %v767_v4, %v586_v3 }
  0x20   :  { %327 = vmatpush.bf16.msra.mxu2 %v603_v52  ;;  %v588_v9 = vld [vmem:[#allocation5 + $0x28] sm:$0xf0]  ;;  %v782_v10 = vld [vmem:[#allocation5 + $0xa4] sm:$0xf]  ;;  %v651_v14 = vor.u32 %v783_v7, %v650_v5  ;;  %v578_v16 = vld [vmem:[#allocation5 + $0x10] sm:$0xf] }
  0x21   :  { %340 = vmatpush.bf16.msra.mxu3 %v667_v53  ;;  %v652_v11 = vld [vmem:[#allocation5 + $0xa8] sm:$0xf0]  ;;  %v591_v15 = vor.u32 %v766_v8, %v588_v9  ;;  %v765_v17 = vld [vmem:[#allocation5 + $0x14] sm:$0xf0]  ;;  %v642_v18 = vld [vmem:[#allocation5 + $0x90] sm:$0xf] }
  0x22   :  { %v655_v19 = vor.u32 %v782_v10, %v652_v11  ;;  %v781_v20 = vld [vmem:[#allocation5 + $0x94] sm:$0xf0]  ;;  %v764_v21 = vld [vmem:[#allocation5 + $0x14] sm:$0xf]  ;;  %v580_v22 = vld [vmem:[#allocation5 + $0x18] sm:$0xf0]  ;;  %v579_v25 = vor.u32 %v765_v17, %v578_v16 }
  0x23   :  { %353 = vmatpush.bf16.msrb.mxu0 %v607_v54  ;;  %366 = vmatpush.bf16.msrb.mxu1 %v671_v58  ;;  %v780_v23 = vld [vmem:[#allocation5 + $0x94] sm:$0xf]  ;;  %v644_v24 = vld [vmem:[#allocation5 + $0x98] sm:$0xf0]  ;;  %v74_v26 = vand.u32 127, %v73_v13  ;;  %v643_v27 = vor.u32 %v781_v20, %v642_v18  ;;  %v583_v28 = vor.u32 %v764_v21, %v580_v22  ;;  %v932_v31 = vmov 0.0  }
  0x24   :  { %328 = vmatpush.bf16.msra.mxu2 %v595_v0  ;;  %v647_v29 = vor.u32 %v780_v23, %v644_v24  ;;  %vm94_vm1 = vcmask 130048   ;;  %v570_v34 = vld [vmem:[#allocation5] sm:$0xf]  ;;  %v763_v35 = vld [vmem:[#allocation5 + $0x4] sm:$0xf0]  ;;  %v809_v46 = vld [vmem:[#allocation7 + $0x78] sm:$0xff] }
  0x25   :  { %341 = vmatpush.bf16.msra.mxu3 %v659_v1  ;;  %v634_v36 = vld [vmem:[#allocation5 + $0x80] sm:$0xf]  ;;  %v571_v37 = vor.u32 %v763_v35, %v570_v34  ;;  %v779_v38 = vld [vmem:[#allocation5 + $0x84] sm:$0xf0]  ;;  %v762_v39 = vld [vmem:[#allocation5 + $0x4] sm:$0xf] }
  0x26   :  { %v572_v40 = vld [vmem:[#allocation5 + $0x8] sm:$0xf0]  ;;  %v635_v41 = vor.u32 %v779_v38, %v634_v36  ;;  %v778_v43 = vld [vmem:[#allocation5 + $0x84] sm:$0xf]  ;;  %v801_v47 = vld [vmem:[#allocation7 + $0x38] sm:$0xff]  ;;  %s933_s17 = smov [#allocation8]  }
  0x27   :  { %354 = vmatpush.bf16.msrb.mxu0 %v599_v2  ;;  %367 = vmatpush.bf16.msrb.mxu1 %v663_v6  ;;  %v575_v42 = vor.u32 %v762_v39, %v572_v40  ;;  %v636_v44 = vld [vmem:[#allocation5 + $0x88] sm:$0xf0]  ;;  %v808_v48 = vld [vmem:[#allocation7 + $0x70] sm:$0xff]  ;;  %v806_v52 = vld [vmem:[#allocation7 + $0x60] sm:$0xff]  ;;  %s544_s18 = sshll.u32 %s933_s17, 4  ;;  %s546_s21 = sshll.u32 %s996_s6, 4  ;;  %s545_s18 = int_to_ptr.vmem [resolvable:$true] %s544_s18  ;;  %s547_s21 = int_to_ptr.hbm [resolvable:$true] %s546_s21 }
  0x28   :  { %329 = vmatpush.bf16.msra.mxu2 %v587_v12  ;;  %v639_v45 = vor.u32 %v778_v43, %v636_v44  ;;  %v800_v49 = vld [vmem:[#allocation7 + $0x30] sm:$0xff]  ;;  %v807_v50 = vld [vmem:[#allocation7 + $0x68] sm:$0xff]  ;;  %v798_v53 = vld [vmem:[#allocation7 + $0x20] sm:$0xff] }
  0x29   :  { %342 = vmatpush.bf16.msra.mxu3 %v651_v14  ;;  %v799_v51 = vld [vmem:[#allocation7 + $0x28] sm:$0xff]  ;;  %v805_v54 = vld [vmem:[#allocation7 + $0x58] sm:$0xff]  ;;  %v804_v55 = vld [vmem:[#allocation7 + $0x50] sm:$0xff] }
  0x2a   :  { %v797_v62 = vld [vmem:[#allocation7 + $0x18] sm:$0xff]  ;;  %v803_v63 = vld [vmem:[#allocation7 + $0x48] sm:$0xff]  ;;  %v796_v0 = vld [vmem:[#allocation7 + $0x10] sm:$0xff] }
  0x2b   :  { %355 = vmatpush.bf16.msrb.mxu0 %v591_v15  ;;  %368 = vmatpush.bf16.msrb.mxu1 %v655_v19  ;;  %v802_v1 = vld [vmem:[#allocation7 + $0x40] sm:$0xff]  ;;  %v795_v2 = vld [vmem:[#allocation7 + $0x8] sm:$0xff]  ;;  %v158_v4 = vld [vmem:[%s993_s3] sm:$0x3] }
  0x2c   :  { %330 = vmatpush.bf16.msra.mxu2 %v579_v25  ;;  %v794_v3 = vld [vmem:[#allocation7] sm:$0xff]  ;;  %v161_v5 = vperm.slane %v158_v4, 1  ;;  %v160_v9 = vperm.slane %v158_v4, 0  ;;  %v821_v24 = vld [vmem:[%s995_s5] ss:$0 sm:$0xff] }
  0x2d   :  { %343 = vmatpush.bf16.msra.mxu3 %v643_v27 }
  0x2f   :  { %356 = vmatpush.bf16.msrb.mxu0 %v583_v28  ;;  %369 = vmatpush.bf16.msrb.mxu1 %v647_v29 }
  0x30   :  { %331 = vmatpush.bf16.msra.mxu2 %v571_v37 }
  0x31   :  { %344 = vmatpush.bf16.msra.mxu3 %v635_v41 }
  0x33   :  { %357 = vmatpush.bf16.msrb.mxu0 %v575_v42  ;;  %370 = vmatpush.bf16.msrb.mxu1 %v639_v45 }
  0x34   :  { %512 = vmatpush.bf16.msrb.mxu2 %v801_v47 }
  0x35   :  { %525 = vmatpush.bf16.msrb.mxu3 %v809_v46 }
  0x38   :  { %513 = vmatpush.bf16.msrb.mxu2 %v800_v49 }
  0x39   :  { %526 = vmatpush.bf16.msrb.mxu3 %v808_v48 }
  0x3c   :  { %514 = vmatpush.bf16.msrb.mxu2 %v799_v51 }
  0x3d   :  { %527 = vmatpush.bf16.msrb.mxu3 %v807_v50 }
  0x40   :  { %515 = vmatpush.bf16.msrb.mxu2 %v798_v53 }
  0x41   :  { %528 = vmatpush.bf16.msrb.mxu3 %v806_v52 }
  0x44   :  { %516 = vmatpush.bf16.msrb.mxu2 %v797_v62 }
  0x45   :  { %529 = vmatpush.bf16.msrb.mxu3 %v805_v54 }
  0x48   :  { %517 = vmatpush.bf16.msrb.mxu2 %v796_v0 }
  0x49   :  { %530 = vmatpush.bf16.msrb.mxu3 %v804_v55 }
  0x4c   :  { %518 = vmatpush.bf16.msrb.mxu2 %v795_v2 }
  0x4d   :  { %531 = vmatpush.bf16.msrb.mxu3 %v803_v63 }
  0x50   :  { %519 = vmatpush.bf16.msrb.mxu2 %v794_v3 }
  0x51   :  { %532 = vmatpush.bf16.msrb.mxu3 %v802_v1 }
  0x83   :  { %v77_v30 = vpop.permute.xlu0 %76 }
  0x84   :  { %vm78_vm0 = vcmp.eq.s32.totalorder %v77_v30, %v74_v26 }
  0x85   :  { %v557_v32 = vsel %vm78_vm0, 1.0, %v932_v31 }
  0x86   :  { %v81_v33 = vpack.c.bf16 %v557_v32, %v557_v32 }
  0x88   :  { %566 = vmatmul.msk.bf16.vlgmr.msra.gmra.mxu0 %vm94_vm1, %v81_v33  ;;  %567 = vmatmul.msk.bf16.vlgmr.msra.gmra.mxu1 %vm94_vm1, %v81_v33 }
 0x105   :  { %v107_v56 = vpop.f32.mrf.mxu0  ;;  %v120_v57 = vpop.f32.mrf.mxu1 }
 0x106   :  { %v124_v58 = vpack.c.bf16 %v107_v56, %v107_v56  ;;  %v125_v59 = vpack.c.bf16 %v120_v57, %v120_v57 }
 0x108   :  { %332 = vmatmul.bf16.vlgmr.msra.gmra.mxu2 %v124_v58  ;;  %345 = vmatmul.bf16.vlgmr.msra.gmra.mxu3 %v125_v59 }
 0x109   :  { %358 = vmatmul.bf16.vlgmr.msrb.gmra.mxu0 %v124_v58  ;;  %371 = vmatmul.bf16.vlgmr.msrb.gmra.mxu1 %v125_v59 }
 0x10d   :  { %v109_v60 = vpop.f32.mrf.mxu0  ;;  %v122_v61 = vpop.f32.mrf.mxu1 }
 0x186   :  { %v359_v6 = vpop.f32.mrf.mxu0  ;;  %v372_v7 = vpop.f32.mrf.mxu1 }
 0x187   :  { %v360_v8 = vadd.f32 %v359_v6, %v161_v5 }
 0x189   :  { %v373_v10 = vadd.f32 %v372_v7, %v360_v8 }
 0x18b   :  { %v377_v11 = vmax.f32 %v373_v10, 0.0  ;;  %v333_v12 = vpop.f32.mrf.mxu2  ;;  %v346_v13 = vpop.f32.mrf.mxu3 }
 0x18c   :  { %v334_v14 = vadd.f32 %v333_v12, %v160_v9 }
 0x18d   :  { %v379_v15 = vpack.c.bf16 %v377_v11, %v377_v11 }
 0x18e   :  { %v347_v16 = vadd.f32 %v346_v13, %v334_v14  ;;  %v361_v17 = vpop.f32.mrf.mxu0  ;;  %v374_v18 = vpop.f32.mrf.mxu1 }
 0x18f   :  { %533 = vmatmul.bf16.vlgmr.msrb.gmra.mxu3 %v379_v15 }
 0x190   :  { %v376_v19 = vmax.f32 %v347_v16, 0.0 }
 0x192   :  { %v378_v20 = vpack.c.bf16 %v376_v19, %v376_v19 }
 0x193   :  { %v335_v21 = vpop.f32.mrf.mxu2  ;;  %v348_v22 = vpop.f32.mrf.mxu3 }
 0x194   :  { %520 = vmatmul.bf16.vlgmr.msrb.gmra.mxu2 %v378_v20 }
 0x212   :  { %v534_v23 = vpop.f32.mrf.mxu3 }
 0x217   :  { %v521_v25 = vpop.f32.mrf.mxu2 }
 0x218   :  { %v522_v26 = vadd.f32 %v821_v24, %v521_v25 }
 0x21a   :  { %v535_v27 = vadd.f32 %v534_v23, %v522_v26  ;;  %v536_v28 = vpop.f32.mrf.mxu3 }
 0x21c   :  { %538 = vst [vmem:[#allocation8] sm:$0xff] %v535_v27 }
 0x21d   :  { %549 = dma.vmem_to_hbm [thread:$0]  %s545_s18, 128, %s547_s21, [#allocation4]  }
 0x21f   :  { %v523_v29 = vpop.f32.mrf.mxu2 }
 0x220   :  { %922 = dma.done.wait [#allocation4], 128  }
 0x221   :  { %923 = vsyncadd [#allocation4], 4294967168 }
 0x222   :  { %554 = vsyncpa [#allocation3], 1 }
 0x223   :  { %555 = vsyncpa [#allocation6], 1 }
 0x224   :  { %556 = vsyncpa [#allocation4], 1 }

</bundles_post_ra>
